<compile_context>
chip_gen: v6e
topology: v6e:2x2x1
jax: 0.10.0
libtpu: 0.0.40
codegen_flags: <defaults>
</compile_context>

<pallas_src>
import functools

import jax
import jax.numpy as jnp
from jax.experimental import pallas as pl
from jax.experimental.pallas import tpu as pltpu


def _round_up(v, m):
    return ((v + m - 1) // m) * m


def eva_attention_kernel(x_ref, wqkv_ref, wproj_ref, consts_ref, o_ref, *,
                         num_heads, head_dim, seq_len, qkv_width, out_width,
                         eps):
    H, Dh, N = num_heads, head_dim, seq_len
    A = H * Dh
    D2 = 2 * A                                   # q|k lane span
    mx = wqkv_ref.dtype                          # MXU operand dtype (f32/bf16)

    # Packed constants (one operand):
    #   rows [0:N)    cos table tiled over q|k head blocks        (first 2A cols)
    #   rows [N:2N)   sin gate for the i+1 neighbour (even lanes, negated)
    #   rows [2N:3N)  sin gate for the i-1 neighbour (odd lanes)
    #   row  3N       fused qkv bias (q part pre-scaled)          (first 3A cols)
    #   row  3N+1     projection bias with LN beta folded in      (first Cp cols)
    consts = consts_ref[...]
    cos2 = consts[0:N, :D2]
    sin_dn = consts[N:2 * N, :D2]
    sin_up = consts[2 * N:3 * N, :D2]
    bqkv = consts[3 * N:3 * N + 1, :qkv_width]
    bproj = consts[3 * N + 1:3 * N + 2, :out_width]

    # (1) Fused QKV projection: a single lane-dense MXU push.
    x = x_ref[0].astype(mx)                                        # (N, C)
    qkv = jnp.dot(x, wqkv_ref[...],
                  preferred_element_type=jnp.float32) + bqkv       # (N, QKVp) f32

    # (2) RoPE on q|k of all heads at once.  rot(t)[2j] = -t[2j+1],
    #     rot(t)[2j+1] = t[2j]; done as lane shifts + sign-gated sin tables
    #     (no MXU pushes).  Prefix-token rows have cos=1 / sin=0 (identity).
    dn = qkv[:, 1:D2 + 1]                                          # dn[:, i] = qkv[:, i+1]
    up = jnp.concatenate([qkv[:, :1], qkv[:, :D2 - 1]], axis=1)    # up[:, i] = qkv[:, i-1]
    qk = qkv[:, :D2] * cos2 + dn * sin_dn + up * sin_up            # (N, 2A)

    # (3) View the lane-dense result as heads (pure relayout, no compute).
    q = jnp.stack([qk[:, h * Dh:(h + 1) * Dh] for h in range(H)], axis=0)
    k = jnp.stack([qk[:, A + h * Dh:A + (h + 1) * Dh] for h in range(H)], axis=0)
    v = jnp.stack([qkv[:, 2 * A + h * Dh:2 * A + (h + 1) * Dh]
                   for h in range(H)], axis=0)                     # (H, N, Dh)

    # (4) Attention, batched over heads (scale already folded into q columns;
    #     attn_mask=None, dropout p=0).  Softmax math stays f32.
    s = jnp.einsum('hnd,hmd->hnm', q.astype(mx), k.astype(mx),
                   preferred_element_type=jnp.float32)             # (H, N, N)
    s = s - jnp.max(s, axis=-1, keepdims=True)
    p = jnp.exp(s)
    l = jnp.sum(p, axis=-1, keepdims=True)                         # (H, N, 1)
    o = jnp.einsum('hnm,hmd->hnd', p.astype(mx), v.astype(mx),
                   preferred_element_type=jnp.float32)             # (H, N, Dh)
    o = o / l                                                      # exact normalization

    # (5) Heads back onto the lane axis; LayerNorm over attn_dim (gamma/beta
    #     folded into the projection weight/bias host-side).
    o_cols = jnp.concatenate([o[h] for h in range(H)], axis=1)     # (N, A)
    mu = jnp.mean(o_cols, axis=-1, keepdims=True)
    d = o_cols - mu
    var = jnp.mean(d * d, axis=-1, keepdims=True)
    o_n = d * jax.lax.rsqrt(var + eps)

    # (6) Output projection: one lane-dense matmul + folded bias, then a
    #     dense (unmasked) store.
    out = jnp.dot(o_n.astype(mx), wproj_ref[...],
                  preferred_element_type=jnp.float32) + bproj      # (N, Cp)
    o_ref[0] = out.astype(o_ref.dtype)


def eva_attention(x, wqkv, q_bias, k_bias, v_bias, rope, gamma, beta, wproj,
                  bproj, *, num_heads, num_prefix_tokens=1, eps=1e-6,
                  param_dtype=jnp.float32):
    """Packs/folds parameters (done once at load time in a real model) and
    launches the fused kernel.  param_dtype=jnp.bfloat16 gives native-rate MXU
    weights with f32 accumulation."""
    B, N, C = x.shape
    A = wqkv.shape[1] // 3
    H = num_heads
    Dh = A // H
    scale = Dh ** -0.5
    npt = num_prefix_tokens

    qkv_w = _round_up(3 * A, 128)        # lane-dense QKV result width
    out_w = _round_up(C, 128)            # lane-dense output width (pad only if needed)
    slab_w = max(qkv_w, out_w)           # packed-constants slab width

    # --- fold attention scale into the q columns of the fused QKV weight/bias
    col_scale = jnp.concatenate(
        [jnp.full((A,), scale, jnp.float32), jnp.ones((2 * A,), jnp.float32)])
    wqkv_s = wqkv.astype(jnp.float32) * col_scale[None, :]
    qkv_bias = jnp.concatenate([q_bias * scale, k_bias, v_bias])   # (3A,)
    wqkv_p = jnp.pad(wqkv_s, ((0, 0), (0, qkv_w - 3 * A))).astype(param_dtype)

    # --- fold LayerNorm affine into the projection; pad columns if C%128 != 0
    wproj_g = wproj.astype(jnp.float32) * gamma[:, None]           # (A, C)
    bproj_g = bproj + beta @ wproj                                 # (C,)
    wproj_p = jnp.pad(wproj_g, ((0, 0), (0, out_w - C))).astype(param_dtype)

    # --- RoPE tables (prefix tokens get identity rows), tiled across q|k heads
    sin_part, cos_part = jnp.split(rope, 2, axis=-1)               # (N-npt, Dh) each
    cos_full = jnp.concatenate(
        [jnp.ones((npt, Dh), jnp.float32), cos_part], axis=0)      # (N, Dh)
    sin_full = jnp.concatenate(
        [jnp.zeros((npt, Dh), jnp.float32), sin_part], axis=0)
    cos2 = jnp.tile(cos_full, (1, 2 * H))                          # (N, 2A)
    sin2 = jnp.tile(sin_full, (1, 2 * H))
    even = (jnp.arange(2 * A) % 2 == 0)[None, :]
    sin_dn = jnp.where(even, -sin2, 0.0)     # multiplies the i+1 neighbour
    sin_up = jnp.where(even, 0.0, sin2)      # multiplies the i-1 neighbour

    # --- pack the small constants into one slab ------------------------------
    def pad_w(a):
        return jnp.pad(a, ((0, 0), (0, slab_w - a.shape[1])))
    consts = jnp.concatenate(
        [pad_w(cos2), pad_w(sin_dn), pad_w(sin_up),
         pad_w(qkv_bias[None, :]), pad_w(bproj_g[None, :])],
        axis=0).astype(jnp.float32)                                # (3N+2, slab_w)

    kernel = functools.partial(
        eva_attention_kernel, num_heads=H, head_dim=Dh, seq_len=N,
        qkv_width=qkv_w, out_width=out_w, eps=eps)

    out_p = pl.pallas_call(
        kernel,
        out_shape=jax.ShapeDtypeStruct((B, N, out_w), x.dtype),
        grid=(B,),
        in_specs=[
            pl.BlockSpec((1, N, C), lambda b: (b, 0, 0)),          # x
            pl.BlockSpec((C, qkv_w), lambda b: (0, 0)),            # fused qkv weight
            pl.BlockSpec((A, out_w), lambda b: (0, 0)),            # proj weight (LN folded)
            pl.BlockSpec(consts.shape, lambda b: (0, 0)),          # packed constants
        ],
        out_specs=pl.BlockSpec((1, N, out_w), lambda b: (b, 0, 0)),
        compiler_params=pltpu.CompilerParams(
            dimension_semantics=("parallel",)),
    )(x, wqkv_p, wproj_p, consts)

    return out_p if out_w == C else out_p[:, :, :C]


def reference_forward(x, wqkv, q_bias, k_bias, v_bias, rope, gamma, beta,
                      wproj, bproj, *, num_heads, num_prefix_tokens=1,
                      eps=1e-6):
    """Pure-JAX mirror of the PyTorch forward (fused qkv, rope, SDPA, LN, proj)."""
    B, N, C = x.shape
    A = wqkv.shape[1] // 3
    H = num_heads
    Dh = A // H
    scale = Dh ** -0.5
    qkv_bias = jnp.concatenate([q_bias, k_bias, v_bias])
    qkv = x @ wqkv + qkv_bias                                      # (B, N, 3A)
    qkv = qkv.reshape(B, N, 3, H, Dh).transpose(2, 0, 3, 1, 4)
    q, k, v = qkv[0], qkv[1], qkv[2]                               # (B, H, N, Dh)

    def rot(t):
        t2 = t.reshape(*t.shape[:-1], Dh // 2, 2)
        return jnp.stack([-t2[..., 1], t2[..., 0]], axis=-1).reshape(t.shape)

    sin_e, cos_e = jnp.split(rope, 2, axis=-1)                     # (N-npt, Dh)
    npt = num_prefix_tokens

    def apply_rope(t):
        t_pre, t_rot = t[:, :, :npt], t[:, :, npt:]
        t_rot = t_rot * cos_e + rot(t_rot) * sin_e
        return jnp.concatenate([t_pre, t_rot], axis=2)

    q = apply_rope(q)
    k = apply_rope(k)

    s = (q * scale) @ jnp.swapaxes(k, -1, -2)
    p = jax.nn.softmax(s, axis=-1)
    o = p @ v                                                      # (B, H, N, Dh)
    o = jnp.swapaxes(o, 1, 2).reshape(B, N, A)

    mu = o.mean(-1, keepdims=True)
    var = ((o - mu) ** 2).mean(-1, keepdims=True)
    o = (o - mu) / jnp.sqrt(var + eps) * gamma + beta
    return o @ wproj + bproj


if __name__ == "__main__":
    B, N, C = 2, 8, 32
    num_heads, num_prefix_tokens = 4, 1
    head_dim = C // num_heads                                      # 8
    A = num_heads * head_dim                                       # 32
    eps = 1e-6

    key = jax.random.PRNGKey(0)
    ks = jax.random.split(key, 8)

    x = jax.random.normal(ks[0], (B, N, C), dtype=jnp.float32)

    # Parameters (deterministic synthetic init; not a checkpoint).
    wqkv = 0.02 * jax.random.normal(ks[1], (C, 3 * A), dtype=jnp.float32)
    q_bias = 0.05 * jax.random.normal(ks[2], (A,), dtype=jnp.float32)
    k_bias = jnp.zeros((A,), dtype=jnp.float32)                    # EVA: zero k-bias
    v_bias = 0.05 * jax.random.normal(ks[3], (A,), dtype=jnp.float32)
    gamma = 1.0 + 0.1 * jax.random.normal(ks[4], (A,), dtype=jnp.float32)
    beta = 0.1 * jax.random.normal(ks[5], (A,), dtype=jnp.float32)
    wproj = 0.02 * jax.random.normal(ks[6], (A, C), dtype=jnp.float32)
    bproj = 0.05 * jax.random.normal(ks[7], (C,), dtype=jnp.float32)

    # timm rope tensor: (N - npt, 2*head_dim) = cat([sin, cos], -1), interleaved.
    n_rot = N - num_prefix_tokens
    bands = head_dim // 2
    pos = jnp.arange(n_rot, dtype=jnp.float32)
    freqs = 1.0 / (10000.0 ** (jnp.arange(bands, dtype=jnp.float32) / bands))
    ang = pos[:, None] * freqs[None, :]                            # (n_rot, bands)
    sin_i = jnp.repeat(jnp.sin(ang), 2, axis=-1)                   # (n_rot, Dh)
    cos_i = jnp.repeat(jnp.cos(ang), 2, axis=-1)
    rope = jnp.concatenate([sin_i, cos_i], axis=-1)                # (n_rot, 2*Dh)

    ref = reference_forward(x, wqkv, q_bias, k_bias, v_bias, rope, gamma, beta,
                            wproj, bproj, num_heads=num_heads,
                            num_prefix_tokens=num_prefix_tokens, eps=eps)

    # f32 parameters: exact-softmax path, tight tolerance.
    out = eva_attention(x, wqkv, q_bias, k_bias, v_bias, rope, gamma, beta,
                        wproj, bproj, num_heads=num_heads,
                        num_prefix_tokens=num_prefix_tokens, eps=eps)
    out = jax.block_until_ready(out)
    assert out.shape == (B, N, C)
    err = float(jnp.max(jnp.abs(out - ref)))
    assert jnp.allclose(out, ref, atol=1e-4, rtol=1e-4), f"f32 max err {err}"

    # bf16 parameters (production MXU dtype, f32 accumulation): loose tolerance.
    out_bf = eva_attention(x, wqkv, q_bias, k_bias, v_bias, rope, gamma, beta,
                           wproj, bproj, num_heads=num_heads,
                           num_prefix_tokens=num_prefix_tokens, eps=eps,
                           param_dtype=jnp.bfloat16)
    out_bf = jax.block_until_ready(out_bf)
    err_bf = float(jnp.max(jnp.abs(out_bf - ref)))
    assert jnp.allclose(out_bf, ref, atol=5e-2, rtol=5e-2), f"bf16 max err {err_bf}"

    print("KERNEL_OK")
</pallas_src>

<mosaic_0001>
module attributes {stable_mosaic.version = 11 : i64} {
  func.func @eva_attention_kernel(%arg0: i32, %arg1: memref<1x8x32xf32, #tpu.memory_space<vmem>>, %arg2: memref<32x128xf32, #tpu.memory_space<vmem>>, %arg3: memref<32x128xf32, #tpu.memory_space<vmem>>, %arg4: memref<26x128xf32, #tpu.memory_space<vmem>>, %arg5: memref<1x8x128xf32, #tpu.memory_space<vmem>>) attributes {dimension_semantics = [#tpu.dimension_semantics<parallel>], iteration_bounds = array<i64: 2>, scalar_prefetch = 0 : i64, scratch_operands = 0 : i64, tpu.core_type = #tpu.core_type<tc>, window_params = [{transform_indices = @transform_0, window_bounds = array<i64: 1, 8, 32>}, {pipeline_mode = #tpu.pipeline_mode<synchronous>, transform_indices = @transform_1, window_bounds = array<i64: 32, 128>}, {pipeline_mode = #tpu.pipeline_mode<synchronous>, transform_indices = @transform_2, window_bounds = array<i64: 32, 128>}, {pipeline_mode = #tpu.pipeline_mode<synchronous>, transform_indices = @transform_3, window_bounds = array<i64: 26, 128>}, {transform_indices = @transform_4, window_bounds = array<i64: 1, 8, 128>}]} {
    %c0 = arith.constant 0 : index
    %c0_0 = arith.constant 0 : index
    %0 = vector.load %arg4[%c0, %c0_0] : memref<26x128xf32, #tpu.memory_space<vmem>>, vector<26x128xf32>
    %1 = vector.extract_strided_slice %0 {offsets = [0, 0], sizes = [8, 64], strides = [1, 1]} : vector<26x128xf32> to vector<8x64xf32>
    %2 = vector.extract_strided_slice %0 {offsets = [8, 0], sizes = [8, 64], strides = [1, 1]} : vector<26x128xf32> to vector<8x64xf32>
    %3 = vector.extract_strided_slice %0 {offsets = [16, 0], sizes = [8, 64], strides = [1, 1]} : vector<26x128xf32> to vector<8x64xf32>
    %4 = vector.extract_strided_slice %0 {offsets = [24, 0], sizes = [1, 128], strides = [1, 1]} : vector<26x128xf32> to vector<1x128xf32>
    %5 = vector.extract_strided_slice %0 {offsets = [25, 0], sizes = [1, 128], strides = [1, 1]} : vector<26x128xf32> to vector<1x128xf32>
    %c0_1 = arith.constant 0 : index
    %c0_2 = arith.constant 0 : index
    %c0_3 = arith.constant 0 : index
    %6 = vector.load %arg1[%c0_1, %c0_2, %c0_3] : memref<1x8x32xf32, #tpu.memory_space<vmem>>, vector<1x8x32xf32>
    %7 = vector.shape_cast %6 : vector<1x8x32xf32> to vector<8x32xf32>
    %c0_4 = arith.constant 0 : index
    %c0_5 = arith.constant 0 : index
    %8 = vector.load %arg2[%c0_4, %c0_5] : memref<32x128xf32, #tpu.memory_space<vmem>>, vector<32x128xf32>
    %cst = arith.constant dense<0.000000e+00> : vector<8x128xf32>
    %9 = tpu.matmul %7, %8, %cst {dimension_numbers = #tpu.dot_dimension_numbers<[1], [0], [0], [1], [0, 0, 1, 1], [], []>} : vector<8x32xf32>, vector<32x128xf32>, vector<8x128xf32> -> vector<8x128xf32>
    %10 = vector.broadcast %4 : vector<1x128xf32> to vector<8x128xf32>
    %11 = arith.addf %9, %10 : vector<8x128xf32>
    %12 = vector.extract_strided_slice %11 {offsets = [0, 1], sizes = [8, 64], strides = [1, 1]} : vector<8x128xf32> to vector<8x64xf32>
    %13 = vector.extract_strided_slice %11 {offsets = [0, 0], sizes = [8, 1], strides = [1, 1]} : vector<8x128xf32> to vector<8x1xf32>
    %14 = vector.extract_strided_slice %11 {offsets = [0, 0], sizes = [8, 63], strides = [1, 1]} : vector<8x128xf32> to vector<8x63xf32>
    %15 = tpu.concatenate %13, %14 in 1 : vector<8x1xf32>, vector<8x63xf32> -> vector<8x64xf32>
    %16 = vector.extract_strided_slice %11 {offsets = [0, 0], sizes = [8, 64], strides = [1, 1]} : vector<8x128xf32> to vector<8x64xf32>
    %17 = arith.mulf %16, %1 : vector<8x64xf32>
    %18 = arith.mulf %12, %2 : vector<8x64xf32>
    %19 = arith.addf %17, %18 : vector<8x64xf32>
    %20 = arith.mulf %15, %3 : vector<8x64xf32>
    %21 = arith.addf %19, %20 : vector<8x64xf32>
    %22 = vector.extract_strided_slice %21 {offsets = [0, 0], sizes = [8, 8], strides = [1, 1]} : vector<8x64xf32> to vector<8x8xf32>
    %23 = vector.extract_strided_slice %21 {offsets = [0, 8], sizes = [8, 8], strides = [1, 1]} : vector<8x64xf32> to vector<8x8xf32>
    %24 = vector.extract_strided_slice %21 {offsets = [0, 16], sizes = [8, 8], strides = [1, 1]} : vector<8x64xf32> to vector<8x8xf32>
    %25 = vector.extract_strided_slice %21 {offsets = [0, 24], sizes = [8, 8], strides = [1, 1]} : vector<8x64xf32> to vector<8x8xf32>
    %26 = vector.shape_cast %22 : vector<8x8xf32> to vector<1x8x8xf32>
    %27 = vector.shape_cast %23 : vector<8x8xf32> to vector<1x8x8xf32>
    %28 = vector.shape_cast %24 : vector<8x8xf32> to vector<1x8x8xf32>
    %29 = vector.shape_cast %25 : vector<8x8xf32> to vector<1x8x8xf32>
    %30 = tpu.concatenate %26, %27, %28, %29 in 0 : vector<1x8x8xf32>, vector<1x8x8xf32>, vector<1x8x8xf32>, vector<1x8x8xf32> -> vector<4x8x8xf32>
    %31 = vector.extract_strided_slice %21 {offsets = [0, 32], sizes = [8, 8], strides = [1, 1]} : vector<8x64xf32> to vector<8x8xf32>
    %32 = vector.extract_strided_slice %21 {offsets = [0, 40], sizes = [8, 8], strides = [1, 1]} : vector<8x64xf32> to vector<8x8xf32>
    %33 = vector.extract_strided_slice %21 {offsets = [0, 48], sizes = [8, 8], strides = [1, 1]} : vector<8x64xf32> to vector<8x8xf32>
    %34 = vector.extract_strided_slice %21 {offsets = [0, 56], sizes = [8, 8], strides = [1, 1]} : vector<8x64xf32> to vector<8x8xf32>
    %35 = vector.shape_cast %31 : vector<8x8xf32> to vector<1x8x8xf32>
    %36 = vector.shape_cast %32 : vector<8x8xf32> to vector<1x8x8xf32>
    %37 = vector.shape_cast %33 : vector<8x8xf32> to vector<1x8x8xf32>
    %38 = vector.shape_cast %34 : vector<8x8xf32> to vector<1x8x8xf32>
    %39 = tpu.concatenate %35, %36, %37, %38 in 0 : vector<1x8x8xf32>, vector<1x8x8xf32>, vector<1x8x8xf32>, vector<1x8x8xf32> -> vector<4x8x8xf32>
    %40 = vector.extract_strided_slice %11 {offsets = [0, 64], sizes = [8, 8], strides = [1, 1]} : vector<8x128xf32> to vector<8x8xf32>
    %41 = vector.extract_strided_slice %11 {offsets = [0, 72], sizes = [8, 8], strides = [1, 1]} : vector<8x128xf32> to vector<8x8xf32>
    %42 = vector.extract_strided_slice %11 {offsets = [0, 80], sizes = [8, 8], strides = [1, 1]} : vector<8x128xf32> to vector<8x8xf32>
    %43 = vector.extract_strided_slice %11 {offsets = [0, 88], sizes = [8, 8], strides = [1, 1]} : vector<8x128xf32> to vector<8x8xf32>
    %44 = vector.shape_cast %40 : vector<8x8xf32> to vector<1x8x8xf32>
    %45 = vector.shape_cast %41 : vector<8x8xf32> to vector<1x8x8xf32>
    %46 = vector.shape_cast %42 : vector<8x8xf32> to vector<1x8x8xf32>
    %47 = vector.shape_cast %43 : vector<8x8xf32> to vector<1x8x8xf32>
    %48 = tpu.concatenate %44, %45, %46, %47 in 0 : vector<1x8x8xf32>, vector<1x8x8xf32>, vector<1x8x8xf32>, vector<1x8x8xf32> -> vector<4x8x8xf32>
    "tpu.trace_start"() <{level = 10 : i32, message = "hnd,hmd->hnm"}> : () -> ()
    %cst_6 = arith.constant dense<0.000000e+00> : vector<4x8x8xf32>
    %49 = tpu.matmul %30, %39, %cst_6 {dimension_numbers = #tpu.dot_dimension_numbers<[2], [2], [1], [1], [0, 0, 0, 1, 1, 1], [0], [0]>} : vector<4x8x8xf32>, vector<4x8x8xf32>, vector<4x8x8xf32> -> vector<4x8x8xf32>
    "tpu.trace_stop"() : () -> ()
    %cst_7 = arith.constant dense<0xFF800000> : vector<4x8xf32>
    %50 = vector.multi_reduction <maximumf>, %49, %cst_7 [2] : vector<4x8x8xf32> to vector<4x8xf32>
    %51 = vector.shape_cast %50 : vector<4x8xf32> to vector<4x8x1xf32>
    %52 = vector.broadcast %51 : vector<4x8x1xf32> to vector<4x8x8xf32>
    %53 = arith.subf %49, %52 : vector<4x8x8xf32>
    %54 = math.exp %53 : vector<4x8x8xf32>
    %cst_8 = arith.constant dense<0.000000e+00> : vector<4x8xf32>
    %55 = vector.multi_reduction <add>, %54, %cst_8 [2] : vector<4x8x8xf32> to vector<4x8xf32>
    %56 = vector.shape_cast %55 : vector<4x8xf32> to vector<4x8x1xf32>
    "tpu.trace_start"() <{level = 10 : i32, message = "hnm,hmd->hnd"}> : () -> ()
    %cst_9 = arith.constant dense<0.000000e+00> : vector<4x8x8xf32>
    %57 = tpu.matmul %54, %48, %cst_9 {dimension_numbers = #tpu.dot_dimension_numbers<[2], [1], [1], [2], [0, 0, 0, 1, 1, 2], [0], [0]>} : vector<4x8x8xf32>, vector<4x8x8xf32>, vector<4x8x8xf32> -> vector<4x8x8xf32>
    "tpu.trace_stop"() : () -> ()
    %58 = vector.broadcast %56 : vector<4x8x1xf32> to vector<4x8x8xf32>
    %59 = arith.divf %57, %58 : vector<4x8x8xf32>
    %60 = vector.extract_strided_slice %59 {offsets = [0, 0, 0], sizes = [1, 8, 8], strides = [1, 1, 1]} : vector<4x8x8xf32> to vector<1x8x8xf32>
    %61 = vector.shape_cast %60 : vector<1x8x8xf32> to vector<8x8xf32>
    %62 = vector.extract_strided_slice %59 {offsets = [1, 0, 0], sizes = [1, 8, 8], strides = [1, 1, 1]} : vector<4x8x8xf32> to vector<1x8x8xf32>
    %63 = vector.shape_cast %62 : vector<1x8x8xf32> to vector<8x8xf32>
    %64 = vector.extract_strided_slice %59 {offsets = [2, 0, 0], sizes = [1, 8, 8], strides = [1, 1, 1]} : vector<4x8x8xf32> to vector<1x8x8xf32>
    %65 = vector.shape_cast %64 : vector<1x8x8xf32> to vector<8x8xf32>
    %66 = vector.extract_strided_slice %59 {offsets = [3, 0, 0], sizes = [1, 8, 8], strides = [1, 1, 1]} : vector<4x8x8xf32> to vector<1x8x8xf32>
    %67 = vector.shape_cast %66 : vector<1x8x8xf32> to vector<8x8xf32>
    %68 = tpu.concatenate %61, %63, %65, %67 in 1 : vector<8x8xf32>, vector<8x8xf32>, vector<8x8xf32>, vector<8x8xf32> -> vector<8x32xf32>
    %cst_10 = arith.constant dense<0.000000e+00> : vector<8xf32>
    %69 = vector.multi_reduction <add>, %68, %cst_10 [1] : vector<8x32xf32> to vector<8xf32>
    %70 = vector.shape_cast %69 : vector<8xf32> to vector<8x1xf32>
    %cst_11 = arith.constant 3.200000e+01 : f32
    %71 = vector.broadcast %cst_11 : f32 to vector<8x1xf32>
    %72 = arith.divf %70, %71 : vector<8x1xf32>
    %73 = vector.broadcast %72 : vector<8x1xf32> to vector<8x32xf32>
    %74 = arith.subf %68, %73 : vector<8x32xf32>
    %75 = arith.mulf %74, %74 : vector<8x32xf32>
    %cst_12 = arith.constant dense<0.000000e+00> : vector<8xf32>
    %76 = vector.multi_reduction <add>, %75, %cst_12 [1] : vector<8x32xf32> to vector<8xf32>
    %77 = vector.shape_cast %76 : vector<8xf32> to vector<8x1xf32>
    %cst_13 = arith.constant 3.200000e+01 : f32
    %78 = vector.broadcast %cst_13 : f32 to vector<8x1xf32>
    %79 = arith.divf %77, %78 : vector<8x1xf32>
    %cst_14 = arith.constant 9.99999997E-7 : f32
    %80 = vector.broadcast %cst_14 : f32 to vector<8x1xf32>
    %81 = arith.addf %79, %80 : vector<8x1xf32>
    %82 = math.rsqrt %81 : vector<8x1xf32>
    %83 = vector.broadcast %82 : vector<8x1xf32> to vector<8x32xf32>
    %84 = arith.mulf %74, %83 : vector<8x32xf32>
    %c0_15 = arith.constant 0 : index
    %c0_16 = arith.constant 0 : index
    %85 = vector.load %arg3[%c0_15, %c0_16] : memref<32x128xf32, #tpu.memory_space<vmem>>, vector<32x128xf32>
    %cst_17 = arith.constant dense<0.000000e+00> : vector<8x128xf32>
    %86 = tpu.matmul %84, %85, %cst_17 {dimension_numbers = #tpu.dot_dimension_numbers<[1], [0], [0], [1], [0, 0, 1, 1], [], []>} : vector<8x32xf32>, vector<32x128xf32>, vector<8x128xf32> -> vector<8x128xf32>
    %87 = vector.broadcast %5 : vector<1x128xf32> to vector<8x128xf32>
    %88 = arith.addf %86, %87 : vector<8x128xf32>
    %c0_18 = arith.constant 0 : index
    %c0_19 = arith.constant 0 : index
    %c0_20 = arith.constant 0 : index
    %89 = vector.load %arg5[%c0_18, %c0_19, %c0_20] : memref<1x8x128xf32, #tpu.memory_space<vmem>>, vector<1x8x128xf32>
    %90 = vector.shape_cast %89 : vector<1x8x128xf32> to vector<8x128xf32>
    %91 = vector.shape_cast %88 : vector<8x128xf32> to vector<1x8x128xf32>
    tpu.vector_store %arg5[%c0_18, %c0_19, %c0_20], %91 {strides = array<i32>} : memref<1x8x128xf32, #tpu.memory_space<vmem>>, vector<1x8x128xf32>,
    return
  }
  func.func @transform_0(%arg0: i32) -> (i32, i32, i32) {
    %c0_i32 = arith.constant 0 : i32
    %c0_i32_0 = arith.constant 0 : i32
    %c0_i32_1 = arith.constant 0 : i32
    return %arg0, %c0_i32, %c0_i32_0 : i32, i32, i32
  }
  func.func @transform_1(%arg0: i32) -> (i32, i32) {
    %c0_i32 = arith.constant 0 : i32
    %c0_i32_0 = arith.constant 0 : i32
    %c0_i32_1 = arith.constant 0 : i32
    return %c0_i32, %c0_i32_0 : i32, i32
  }
  func.func @transform_2(%arg0: i32) -> (i32, i32) {
    %c0_i32 = arith.constant 0 : i32
    %c0_i32_0 = arith.constant 0 : i32
    %c0_i32_1 = arith.constant 0 : i32
    return %c0_i32, %c0_i32_0 : i32, i32
  }
  func.func @transform_3(%arg0: i32) -> (i32, i32) {
    %c0_i32 = arith.constant 0 : i32
    %c0_i32_0 = arith.constant 0 : i32
    %c0_i32_1 = arith.constant 0 : i32
    return %c0_i32, %c0_i32_0 : i32, i32
  }
  func.func @transform_4(%arg0: i32) -> (i32, i32, i32) {
    %c0_i32 = arith.constant 0 : i32
    %c0_i32_0 = arith.constant 0 : i32
    %c0_i32_1 = arith.constant 0 : i32
    return %arg0, %c0_i32, %c0_i32_0 : i32, i32, i32
  }
}

</mosaic_0001>

<bundles_post_ra>
// kernel: tpu_custom_call.1
= control target key start
LH: loop header
LB: loop body
LE: loop exit
PB: predicated region body
PF: predicated region fallthrough
CT: control target
= control target key end

     0   :  { %9 = vsyncpa [#allocation3], 0  ;;  %s1968_s0 = inlined_call_operand.hbm [shape: f32[2,8,32], index: 0, kind: input, shape index: {}]   ;;  %s1969_s1 = inlined_call_operand.hbm [shape: f32[32,128], index: 1, kind: input, shape index: {}]   ;;  %s1970_s2 = inlined_call_operand.hbm [shape: f32[32,128], index: 2, kind: input, shape index: {}]   ;;  %s1971_s3 = inlined_call_operand.hbm [shape: f32[26,128], index: 3, kind: input, shape index: {}]   ;;  %s1972_s4 = inlined_call_operand.hbm [shape: f32[2,8,128], index: 4, kind: output, shape index: {}]  }
   0x1   :  { %11 = vsyncpa [#allocation3 + $0x1], 0 }
   0x2   :  { %12 = vsyncpa [#allocation6], 0 }
   0x3   :  { %13 = vsyncpa [#allocation9], 0 }
   0x4   :  { %14 = vsyncpa [#allocation4], 0 }
   0x5   :  { %16 = vsyncpa [#allocation4 + $0x1], 0  ;;  %s1708_s15 = smov 0   ;;  %s1710_s16 = smov 0  }
   0x6   :  { %s1712_s17 = smov 0   ;;  %s1714_s18 = smov 0  }
   0x7 LB: > { %s1729_s19 = sadd.s32 4294967295, %s1662_s18   ;;  %s1255_s20 = sadd.s32 4294967294, %s1662_s18   ;;  %s1662_s18 = sphi %s1714_s18, %s1996_s18   ;;  %s1658_s17 = sphi %s1712_s17, %s1995_s17   ;;  %s1654_s16 = sphi %s1710_s16, %s1994_s16   ;;  %s1650_s15 = sphi %s1708_s15, %s1993_s15  }
   0x8   : > { %p42_p0 = scmp.ne.s32.totalorder %s1654_s16, %s1650_s15  ;;  %p1973_p1 = scmp.eq.s32.totalorder %s1729_s19, 0 }
   0x9   : > { %p135_p3 = scmp.eq.s32.totalorder %s1255_s20, 1  ;;  %p1256_p5 = scmp.ge.s32.totalorder %s1662_s18, 1 }
   0xa   : > { %p1738_p4 = por %p1973_p1, %p42_p0  ;;  %p142_p7 = scmp.lt.s32.totalorder %s1662_s18, 3 }
   0xb   : > { %p1743_p6 = por %p135_p3, %p42_p0  ;;  %s1664_s24 = smov [#allocation5]  }
   0xc   : > { %s1977_s21 = scalar_select %p1738_p4, 1, 0 }
   0xd   : > { %s1978_s22 = scalar_select %p1743_p6, 1, 0 }
   0xe   : > { %p1748_p8 = pnand %p1256_p5, %p142_p7  ;;  %s154_s25 = sshll.u32 %s1664_s24, 4  ;;  %s155_s25 = int_to_ptr.vmem [resolvable:$true] %s154_s25 }
   0xf   : > { %s1665_s27 = smov [#allocation7]   ;;  %s1666_s29 = smov [#allocation8]  }
  0x10   : > { %s1979_s23 = scalar_select %p1748_p8, 1, 0 }
  0x11   : > { %p1391_p9 = pneg %p1748_p8  ;;  %s167_s28 = sshll.u32 %s1665_s27, 4  ;;  %s168_s28 = int_to_ptr.vmem [resolvable:$true] %s167_s28 }
  0x12   : > { %s180_s30 = sshll.u32 %s1666_s29, 4  ;;  %s1495_s5 = scalar_lea.vmem %s155_s25, 512  ;;  %s181_s30 = int_to_ptr.vmem [resolvable:$true] %s180_s30 }
  0x13   : > { %p1757_p11 = pnand %p1391_p9, %p1973_p1  ;;  %p1496_p13 = scmp.ne.s32.totalorder %s155_s25, %s1495_s5 }
  0x14   : > { %p1503_p5 = scmp.lt.s32.totalorder %s155_s25, %s155_s25  ;;  %p1504_p7 = scmp.lt.s32.totalorder %s1495_s5, %s1495_s5 }
  0x15   : > { %p1486_p12 = pneg %p1757_p11 }
  0x16   : > { %p1505_p9 = por %p1504_p7, %p1503_p5 }
  0x17   : > { %p1498_p0 = pnand %p1496_p13, %p1486_p12 }
  0x19   : > { %p1499_p3 = pneg %p1498_p0 }
  0x1b   : > { %p1506_p10 = pnand %p1505_p9, %p1499_p3 }
  0x1d   : > { %1509 = shalt.err (!%p1506_p10)
}
  0x1e   : > { %s1667_s6 = smov 128   ;;  %s1668_s7 = smov 8  }
  0x1f   : > { %1394 = dma.hbm_to_vmem [thread:$0]  (!%p1757_p11), %s1969_s1, 512, %s155_s25, [#allocation6], %s1667_s6, %s1667_s6, %s1668_s7  }
  0x20   : > { %s1521_s10 = scalar_lea.vmem %s168_s28, 512  ;;  %p1529_p2 = scmp.lt.s32.totalorder %s168_s28, %s168_s28 }
  0x21   : > { %p1522_p1 = scmp.ne.s32.totalorder %s168_s28, %s1521_s10  ;;  %p1530_p6 = scmp.lt.s32.totalorder %s1521_s10, %s1521_s10 }
  0x23   : > { %p1524_p13 = pnand %p1522_p1, %p1486_p12  ;;  %p1531_p5 = por %p1530_p6, %p1529_p2 }
  0x25   : > { %p1525_p0 = pneg %p1524_p13 }
  0x27   : > { %p1532_p3 = pnand %p1531_p5, %p1525_p0 }
  0x29   : > { %1535 = shalt.err (!%p1532_p3)
}
  0x2a   : > { %1397 = dma.hbm_to_vmem [thread:$0]  (!%p1757_p11), %s1970_s2, 512, %s168_s28, [#allocation6], %s1667_s6, %s1667_s6, %s1668_s7  }
  0x2b   : > { %s1547_s13 = scalar_lea.vmem %s181_s30, 512  ;;  %p1555_p9 = scmp.lt.s32.totalorder %s181_s30, %s181_s30 }
  0x2c   : > { %p1548_p10 = scmp.ne.s32.totalorder %s181_s30, %s1547_s13  ;;  %p1556_p13 = scmp.lt.s32.totalorder %s1547_s13, %s1547_s13 }
  0x2e   : > { %p1550_p7 = pnand %p1548_p10, %p1486_p12  ;;  %p1557_p4 = por %p1556_p13, %p1555_p9 }
  0x30   : > { %p1551_p1 = pneg %p1550_p7 }
  0x32   : > { %p1558_p2 = pnand %p1557_p4, %p1551_p1 }
  0x34   : > { %1561 = shalt.err (!%p1558_p2)
}
  0x35   : > { %1400 = dma.hbm_to_vmem [thread:$0]  (!%p1757_p11), %s1971_s3, 512, %s181_s30, [#allocation9], %s1667_s6, %s1667_s6, %s1668_s7  }
  0x36   : > { %s1788_s24 = sadd.s32 1, %s1662_s18   ;;  %s29_s26 = sadd.s32 1, %s1658_s17 }
  0x37   : > { %s26_s25 = ssub.s32 %s1662_s18, %s1788_s24  ;;  %p36_p6 = scmp.ne.s32.totalorder %s1658_s17, %s1654_s16 }
  0x38   : > { %p27_p4 = scmp.eq.s32.totalorder %s26_s25, 0  ;;  %p37_p12 = scmp.eq.s32.totalorder %s1662_s18, 0 }
  0x39   : > { %p1412_p0 = scmp.lt.s32.totalorder %s1662_s18, 2  ;;  %p1981_p3 = scmp.eq.s32.totalorder %s1729_s19, 1 }
  0x3a   : > { %s1798_s27 = scalar_select %p27_p4, %s1658_s17, %s29_s26  }
  0x3b   : > { %p38_p5 = por %p37_p12, %p36_p6  ;;  %p1802_p10 = por %p1981_p3, %p36_p6 }
  0x3c   : > { %s194_s29 = sand.u32 1, %s1658_s17   ;;  %s1262_s5 = sshll.u32 %s1662_s18, 7 }
  0x3d   : > { %s1982_s28 = scalar_select %p1802_p10, 1, 0 }
  0x3e   : > { %s1261_s30 = sshll.u32 %s194_s29, 3  ;;  %s1811_s8 = scalar_lea.hbm %s1968_s0, %s1262_s5 }
  0x3f   : > { %s198_s9 = scalar_lea.vmem [#allocation2], %s1261_s30  ;;  %p1813_p11 = pnand %p1412_p0, %p38_p5 }
  0x40   : > { %s205_s10 = sshll.u32 %s198_s9, 4  ;;  %s195_s12 = scalar_lea.sflag [#allocation3], %s194_s29  ;;  %s206_s10 = int_to_ptr.vmem [resolvable:$true] %s205_s10 }
  0x41   : > { %s1562_s13 = scalar_lea.hbm %s1811_s8, 128  ;;  %p1564_p1 = pneg %p1813_p11 }
  0x42   : > { %p1563_p7 = scmp.ne.s32.totalorder %s1811_s8, %s1562_s13  ;;  %s1567_s25 = scalar_lea.hbm %s1968_s0, 256 }
  0x43   : > { %p1568_p2 = scmp.lt.s32.totalorder %s1811_s8, %s1968_s0  ;;  %p1569_p4 = scmp.lt.s32.totalorder %s1567_s25, %s1562_s13 }
  0x44   : > { %p1565_p9 = pnand %p1564_p1, %p1563_p7 }
  0x45   : > { %p1570_p6 = por %p1569_p4, %p1568_p2 }
  0x46   : > { %p1566_p13 = pneg %p1565_p9 }
  0x48   : > { %p1571_p12 = pnand %p1570_p6, %p1566_p13 }
  0x4a   : > { %1574 = shalt.err (!%p1571_p12)
}
  0x4b   : > { %s1575_s30 = scalar_lea.vmem %s206_s10, 128  ;;  %s1669_s29 = smov [#allocation2]  }
  0x4c   : > { %p1576_p0 = scmp.ne.s32.totalorder %s206_s10, %s1575_s30  ;;  %s1580_s6 = sshll.u32 %s1669_s29, 4  ;;  %s1581_s6 = int_to_ptr.vmem [resolvable:$false] %s1580_s6 }
  0x4d   : > { %s1582_s7 = scalar_lea.vmem %s1581_s6, 256  ;;  %p1583_p7 = scmp.lt.s32.totalorder %s206_s10, %s1581_s6 }
  0x4e   : > { %p1578_p5 = pnand %p1576_p0, %p1564_p1  ;;  %p1584_p9 = scmp.lt.s32.totalorder %s1582_s7, %s1575_s30 }
  0x50   : > { %p1579_p3 = pneg %p1578_p5  ;;  %p1585_p10 = por %p1584_p9, %p1583_p7 }
  0x52   : > { %p1586_p8 = pnand %p1585_p10, %p1579_p3 }
  0x54   : > { %1589 = shalt.err (!%p1586_p8)
}
  0x55   : > { %1404 = dma.hbm_to_vmem [thread:$0]  (!%p1813_p11), %s1811_s8, 128, %s206_s10, %s195_s12  }
  0x56   : > { %p1984_p13 = scmp.ne.s32.totalorder %s1979_s23, 0 }
  0x57   : > { %s1834_s9 = sand.u32 (!%p1984_p13), 1, %s1654_s16   ;;  %p1985_p10 = scmp.ne.s32.totalorder (!%p1984_p13), %s1977_s21, 0 }
  0x58   : > { %214 = sbr.rel (%p1984_p13) target bundleno = 1840 (0x730), region = 36  ;;  %s1264_s13 = sshll.u32 (!%p1984_p13), %s1834_s9, 3 }
  0x59   : > { %s217_s14 = scalar_lea.sflag (!%p1984_p13), [#allocation3], %s1834_s9  ;;  %s220_s20 = scalar_lea.vmem (!%p1984_p13), [#allocation2], %s1264_s13 }
  0x5d   : > { %1633 = dma.done.wait (%p1985_p10), %s217_s14, 128  }
  0x5e   : > { %1635 = vsyncadd (%p1985_p10), %s217_s14, 4294967168  ;;  %p1986_p8 = scmp.eq.s32.totalorder %s1729_s19, 0 }
  0x60   : > { %1637 = dma.done.wait (%p1986_p8), [#allocation6], 1024   ;;  %p1987_p11 = pmov %p1986_p8 }
  0x61   : > { %p1988_p1 = pmov %p1986_p8 }
  0x62   : > { %1639 = vsyncadd (%p1987_p11), [#allocation6], 4294966272 }
  0x63   : > { %1641 = dma.done.wait (%p1988_p1), [#allocation9], 512   ;;  %p1989_p2 = pmov %p1988_p1 }
  0x64   : > { %v1670_v0 = vmov 0.0   ;;  %vm1671_vm0 = vmmov 0   ;;  %v265_v1 = vld [vmem:[#allocation5 + $0x18] sm:$0xff]  ;;  %v264_v2 = vld [vmem:[#allocation5 + $0x10] sm:$0xff]  ;;  %v258_v3 = vld [vmem:[#allocation8 + $0x8] sm:$0xff]  ;;  %s1672_s21 = smov 1   ;;  %v266_v7 = vlaneseq }
  0x65   : > { %1643 = vsyncadd (%p1989_p2), [#allocation9], 4294966784  ;;  %1313 = vmatprep.subr.mxu0 %v1670_v0  ;;  %1321 = vmatprep.mubr.msk.f32.mxu0 %vm1671_vm0, %v1670_v0  ;;  %v263_v4 = vld [vmem:[#allocation5 + $0x8] sm:$0xff]  ;;  %v262_v5 = vld [vmem:[#allocation5] sm:$0xff]  ;;  %vm270_vm1 = vcmask 261120   ;;  %s1673_s23 = smov 127  }
  0x66   : > { %1324 = vmatprep.subr.mxu1 %v1670_v0  ;;  %1326 = vmatprep.mubr.msk.f32.mxu1 %vm1671_vm0, %v1670_v0  ;;  %v261_v6 = vld [vmem:[%s220_s20] sm:$0xff]  ;;  %v1865_v8 = vshrl.u32 %v266_v7, 7  ;;  %vm348_vm2 = vcmask 7168   ;;  %v257_v17 = vld [vmem:[#allocation8] sm:$0xff]  ;;  %s1674_s8 = smov 112   ;;  %s1675_s10 = smov 120  }
  0x67   : > { %1314 = vmatpush3.msra.mxu0 %v265_v1  ;;  %352 = vrot.lane.b32.xlu0 %v258_v3, %s1672_s21  ;;  %v1868_v10 = vld [vmem:[#allocation8 + $0x18] sm:$0x3]  ;;  %v259_v18 = vld [vmem:[#allocation8 + $0x10] sm:$0xff]  ;;  %s1676_s11 = smov 96   ;;  %s1677_s12 = smov 104   ;;  %vm378_vm3 = vcmask 64512  }
  0x68   : > { %1315 = vmatprep.subr.mxu0 %v1670_v0  ;;  %v268_v9 = vsub.s32 0, %v1865_v8  ;;  %s1678_s25 = smov 64   ;;  %s1679_s26 = smov 8   ;;  %vm1042_vm4 = vcmask 130048   ;;  %vm1044_vm5 = vcmask 195584  }
  0x69   : > { %1316 = vmatpush3.msra.mxu0 %v264_v2  ;;  %s1680_s5 = smov 16   ;;  %s1681_s30 = smov 24  }
  0x6a   : > { %1317 = vmatprep.subr.mxu0 %v1670_v0  ;;  %v269_v11 = vrot.slane %v1868_v10, %v268_v9  ;;  %s1284_s29 = sshll.u32 %s1729_s19, 7  ;;  %s256_s6 = scalar_lea.vmem [#allocation10], %s1264_s13 }
  0x6b   : > { %1318 = vmatpush3.msra.mxu0 %v263_v4  ;;  %s1156_s7 = sshll.u32 %s256_s6, 4  ;;  %p1990_p6 = scmp.ne.s32.totalorder %s1982_s28, 0  ;;  %s1157_s7 = int_to_ptr.vmem [resolvable:$true] %s1156_s7 }
  0x6c   : > { %1319 = vmatprep.subr.mxu0 %v1670_v0  ;;  %s1682_s19 = smov [#allocation10]  }
  0x6d   : > { %1320 = vmatpush3.msra.mxu0 %v262_v5 }
  0x6e   : > { %1322 = vmatmul.mubr.msk.f32.vlgmr.msra.gmra.mxu0 %vm270_vm1, %v261_v6  ;;  %1344 = vmatprep.subr.mxu0 %v1670_v0 }
  0x6f   : > { %1346 = vmatprep.mubr.msk.f32.mxu0 %vm1671_vm0, %v1670_v0 }
  0xd9   : > { %v353_v13 = vpop.permute.xlu0 %352 }
 0x12e   : > { %v340_v12 = vpop.f32.mrf.mxu0 }
 0x12f   : > { %v341_v14 = vadd.f32 %v340_v12, %v269_v11 }
 0x130   : > { %v1323_v15 = vpop.f32.mrf.mxu0 }
 0x131   : > { %v355_v16 = vmul.f32 %v353_v13, %v341_v14  ;;  %345 = vrot.lane.b32.xlu0 %v341_v14, %s1672_s21  ;;  %v350_v21 = vmul.f32 %v341_v14, %v257_v17  ;;  %s1931_s21 = scalar_lea.hbm %s1972_s4, %s1284_s29 }
 0x133   : > { %357 = vrot.lane.b32.xlu1 %v355_v16, %s1673_s23  ;;  %s1143_s23 = scalar_lea.sflag [#allocation4], %s1834_s9 }
 0x1a3   : > { %v346_v19 = vpop.permute.xlu0 %345 }
 0x1a4   : > { %v349_v20 = vsel %vm348_vm2, %v341_v14, %v346_v19 }
 0x1a5   : > { %v361_v22 = vmul.f32 %v349_v20, %v259_v18  ;;  %v358_v23 = vpop.permute.xlu1 %357 }
 0x1a6   : > { %v360_v24 = vadd.f32 %v358_v23, %v350_v21 }
 0x1a8   : > { %v362_v25 = vadd.f32 %v361_v22, %v360_v24 }
 0x1aa   : > { %366 = vrot.lane.b32.xlu0 %v362_v25, %s1674_s8  ;;  %364 = vrot.lane.b32.xlu1 %v362_v25, %s1675_s10 }
 0x1ae   : > { %376 = vrot.lane.b32.xlu0 %v362_v25, %s1676_s11  ;;  %368 = vrot.lane.b32.xlu1 %v362_v25, %s1677_s12 }
 0x21c   : > { %v367_v26 = vpop.permute.xlu0 %366  ;;  %v365_v27 = vpop.permute.xlu1 %364 }
 0x21d   : > { %529 = vrot.lane.b32.xlu0 %v367_v26, %s1676_s11  ;;  %453 = vrot.lane.b32.xlu1 %v365_v27, %s1676_s11 }
 0x220   : > { %v377_v28 = vpop.permute.xlu0 %376  ;;  %v369_v29 = vpop.permute.xlu1 %368 }
 0x221   : > { %370 = vrot.lane.b32.xlu0 %v341_v14, %s1675_s10  ;;  %1325 = vmatpush3.xpose.msk.msra.mxu1 %vm378_vm3, %v377_v28  ;;  %s1594_s10 = sshll.u32 %s1682_s19, 4  ;;  %s1595_s10 = int_to_ptr.vmem [resolvable:$false] %s1594_s10 }
 0x222   : > { %605 = vrot.lane.b32.xlu1 %v369_v29, %s1676_s11  ;;  %1329 = vmatprep.subr.mxu1 %v1670_v0  ;;  %s1596_s13 = scalar_lea.vmem %s1595_s10, 256  ;;  %p1597_p5 = scmp.lt.s32.totalorder %s1157_s7, %s1595_s10 }
 0x224   : > { %1327 = vmatmul.mubr.msk.f32.vlgmr.msra.gmra.mxu1 %vm378_vm3, %v362_v25 }
 0x225   : > { %374 = vrot.lane.b32.xlu0 %v341_v14, %s1677_s12  ;;  %1331 = vmatprep.mubr.msk.f32.mxu1 %vm1671_vm0, %v1670_v0 }
 0x226   : > { %372 = vrot.lane.b32.xlu1 %v341_v14, %s1674_s8  ;;  %s1590_s8 = scalar_lea.vmem %s1157_s7, 128 }
 0x227   : > { %p1591_p4 = scmp.ne.s32.totalorder %s1157_s7, %s1590_s8  ;;  %p1598_p3 = scmp.lt.s32.totalorder %s1596_s13, %s1590_s8 }
 0x229   : > { %717 = vrot.lane.b32.xlu0 %v341_v14, %s1678_s25  ;;  %p1592_p12 = pnand %p1591_p4, %p1990_p6  ;;  %p1599_p7 = por %p1598_p3, %p1597_p5 }
 0x22b   : > { %p1593_p0 = pneg %p1592_p12 }
 0x22d   : > { %p1600_p9 = pnand %p1599_p7, %p1593_p0 }
 0x28f   : > { %v530_v30 = vpop.permute.xlu0 %529  ;;  %v454_v31 = vpop.permute.xlu1 %453 }
 0x290   : > { %1330 = vmatpush3.xpose.msk.msra.mxu1 %vm378_vm3, %v454_v31 }
 0x291   : > { %1334 = vmatprep.subr.mxu1 %v1670_v0 }
 0x293   : > { %v371_v32 = vpop.permute.xlu0 %370  ;;  %1332 = vmatmul.mubr.msk.f32.vlgmr.msra.gmra.mxu1 %vm378_vm3, %v365_v27 }
 0x294   : > { %793 = vrot.lane.b32.xlu1 %v371_v32, %s1678_s25  ;;  %1335 = vmatpush3.xpose.msk.msra.mxu1 %vm378_vm3, %v530_v30  ;;  %v606_v33 = vpop.permute.xlu1 %605 }
 0x295   : > { %1336 = vmatprep.mubr.msk.f32.mxu1 %vm1671_vm0, %v1670_v0  ;;  %1339 = vmatprep.subr.mxu1 %v1670_v0 }
 0x297   : > { %v375_v34 = vpop.permute.xlu0 %374  ;;  %1337 = vmatmul.mubr.msk.f32.vlgmr.msra.gmra.mxu1 %vm378_vm3, %v367_v26 }
 0x298   : > { %1340 = vmatpush3.xpose.msk.msra.mxu1 %vm378_vm3, %v606_v33  ;;  %1341 = vmatprep.mubr.msk.f32.mxu1 %vm1671_vm0, %v1670_v0  ;;  %v373_v39 = vpop.permute.xlu1 %372 }
 0x299   : > { %1349 = vmatprep.subr.mxu1 %v1670_v0 }
 0x29b   : > { %v718_v35 = vpop.permute.xlu0 %717  ;;  %1342 = vmatmul.mubr.msk.f32.vlgmr.msra.gmra.mxu1 %vm378_vm3, %v369_v29 }
 0x29c   : > { %1345 = vmatpush3.msra.mxu0 %v718_v35  ;;  %1351 = vmatprep.mubr.msk.f32.mxu1 %vm1671_vm0, %v1670_v0 }
 0x29d   : > { %1354 = vmatprep.subr.mxu0 %v1670_v0 }
 0x2e4   : > { %v449_v36 = vpop.f32.mrf.mxu1 }
 0x2e5   : > { %v681_v37 = vsel %vm378_vm3, %v449_v36, -inf }
 0x2e6   : > { %v1328_v38 = vpop.f32.mrf.mxu1  ;;  %682 = vmax.xlane.f32.xlu1 %v681_v37 }
 0x306   : > { %v794_v40 = vpop.permute.xlu1 %793 }
 0x307   : > { %1350 = vmatpush3.msra.mxu1 %v794_v40 }
 0x308   : > { %1359 = vmatprep.subr.mxu1 %v1670_v0 }
 0x353   : > { %v525_v41 = vpop.f32.mrf.mxu1 }
 0x354   : > { %v684_v42 = vsel %vm378_vm3, %v525_v41, -inf }
 0x355   : > { %685 = vmax.xlane.f32.xlu0 %v684_v42  ;;  %v1333_v43 = vpop.f32.mrf.mxu1 }
 0x356   : > { %v1063_v43 = vld [vmem:[#allocation7 + $0x18] sm:$0xff] }
 0x357   : > { %v601_v44 = vpop.f32.mrf.mxu1 }
 0x358   : > { %v687_v45 = vsel %vm378_vm3, %v601_v44, -inf }
 0x359   : > { %688 = vmax.xlane.f32.xlu0 %v687_v45  ;;  %v1338_v46 = vpop.f32.mrf.mxu1  ;;  %v1061_v45 = vld [vmem:[#allocation7 + $0x8] sm:$0xff] }
 0x35a   : > { %v1060_v46 = vld [vmem:[#allocation7] sm:$0xff] }
 0x35b   : > { %v677_v47 = vpop.f32.mrf.mxu1 }
 0x35c   : > { %v690_v48 = vsel %vm378_vm3, %v677_v47, -inf }
 0x35d   : > { %691 = vmax.xlane.f32.xlu1 %v690_v48  ;;  %v1343_v49 = vpop.f32.mrf.mxu1 }
 0x36e   : > { %869 = vrot.lane.b32.xlu1 %v373_v39, %s1678_s25 }
 0x36f   : > { %945 = vrot.lane.b32.xlu0 %v375_v34, %s1678_s25  ;;  %v683_v50 = vpop.xlane.xlu1 %682 }
 0x370   : > { %v693_v51 = vsub.f32 %v449_v36, %v683_v50 }
 0x372   : > { %v697_v52 = vmul.f32 1.442695, %v693_v51 }
 0x374   : > { %1466 = vpow2.f32 %v697_v52  ;;  %v1066_v52 = vsub.s32 1, %v1865_v8 }
 0x381   : > { %v1467_v53 = vpop.eup %1466 }
 0x382   : > { %1347 = vmatmul.mubr.msk.f32.vlgmr.msra.gmra.mxu0 %vm378_vm3, %v1467_v53  ;;  %v705_v6 = vsel %vm378_vm3, %v1467_v53, 0.0  ;;  %v1067_v53 = vrot.slane %v1868_v10, %v1066_v52 }
 0x383   : > { %1356 = vmatprep.mubr.msk.f32.mxu0 %vm1671_vm0, %v1670_v0 }
 0x3de   : > { %v686_v54 = vpop.xlane.xlu0 %685 }
 0x3df   : > { %v694_v55 = vsub.f32 %v525_v41, %v686_v54 }
 0x3e1   : > { %v699_v56 = vmul.f32 1.442695, %v694_v55 }
 0x3e2   : > { %v689_v57 = vpop.xlane.xlu0 %688 }
 0x3e3   : > { %1468 = vpow2.f32 %v699_v56  ;;  %v695_v58 = vsub.f32 %v601_v44, %v689_v57  ;;  %v1062_v44 = vld [vmem:[#allocation7 + $0x10] sm:$0xff] }
 0x3e5   : > { %v701_v59 = vmul.f32 1.442695, %v695_v58 }
 0x3e6   : > { %v692_v60 = vpop.xlane.xlu1 %691  ;;  %v946_v2 = vpop.permute.xlu0 %945 }
 0x3e7   : > { %1470 = vpow2.f32 %v701_v59  ;;  %v696_v61 = vsub.f32 %v677_v47, %v692_v60 }
 0x3e9   : > { %v703_v62 = vmul.f32 1.442695, %v696_v61 }
 0x3ea   : > { %v870_v63 = vpop.permute.xlu1 %869 }
 0x3eb   : > { %1472 = vpow2.f32 %v703_v62  ;;  %1355 = vmatpush3.msra.mxu0 %v870_v63 }
 0x3ec   : > { %1364 = vmatprep.subr.mxu0 %v1670_v0 }
 0x3f0   : > { %v1469_v1 = vpop.eup %1468 }
 0x3f1   : > { %1352 = vmatmul.mubr.msk.f32.vlgmr.msra.gmra.mxu1 %vm378_vm3, %v1469_v1  ;;  %v708_v3 = vsel %vm378_vm3, %v1469_v1, 0.0 }
 0x3f2   : > { %1360 = vmatpush3.msra.mxu1 %v946_v2  ;;  %709 = vadd.xlane.f32.xlu1 %v708_v3 }
 0x3f3   : > { %1361 = vmatprep.mubr.msk.f32.mxu1 %vm1671_vm0, %v1670_v0 }
 0x3f4   : > { %v1471_v4 = vpop.eup %1470 }
 0x3f5   : > { %1357 = vmatmul.mubr.msk.f32.vlgmr.msra.gmra.mxu0 %vm378_vm3, %v1471_v4  ;;  %v711_v5 = vsel %vm378_vm3, %v1471_v4, 0.0 }
 0x3f6   : > { %712 = vadd.xlane.f32.xlu0 %v711_v5  ;;  %706 = vadd.xlane.f32.xlu1 %v705_v6 }
 0x3f7   : > { %1372 = vmatprep.mubr.msk.f32.mxu0 %vm1671_vm0, %v1670_v0  ;;  %1365 = vmatpush3.msra.mxu0 %v1063_v43 }
 0x3f8   : > { %v1473_v7 = vpop.eup %1472  ;;  %1366 = vmatprep.subr.mxu0 %v1670_v0 }
 0x3f9   : > { %1362 = vmatmul.mubr.msk.f32.vlgmr.msra.gmra.mxu1 %vm378_vm3, %v1473_v7  ;;  %v714_v9 = vsel %vm378_vm3, %v1473_v7, 0.0  ;;  %1367 = vmatpush3.msra.mxu0 %v1062_v44 }
 0x3fa   : > { %715 = vadd.xlane.f32.xlu0 %v714_v9  ;;  %1368 = vmatprep.subr.mxu0 %v1670_v0 }
 0x3fb   : > { %1369 = vmatpush3.msra.mxu0 %v1061_v45 }
 0x3fc   : > { %1370 = vmatprep.subr.mxu0 %v1670_v0 }
 0x3fd   : > { %1371 = vmatpush3.msra.mxu0 %v1060_v46 }
 0x442   : > { %v789_v11 = vpop.f32.mrf.mxu0 }
 0x444   : > { %v1348_v12 = vpop.f32.mrf.mxu0 }
 0x47b   : > { %v710_v13 = vpop.xlane.xlu1 %709 }
 0x47c   : > { %1474 = vrcp.f32 %v710_v13 }
 0x47f   : > { %v713_v14 = vpop.xlane.xlu0 %712  ;;  %v707_v28 = vpop.xlane.xlu1 %706 }
 0x480   : > { %1476 = vrcp.f32 %v713_v14 }
 0x483   : > { %v716_v15 = vpop.xlane.xlu0 %715 }
 0x484   : > { %1478 = vrcp.f32 %v716_v15 }
 0x485   : > { %1480 = vrcp.f32 %v707_v28 }
 0x489   : > { %v1475_v16 = vpop.eup %1474 }
 0x48d   : > { %v1477_v20 = vpop.eup %1476 }
 0x491   : > { %v1479_v24 = vpop.eup %1478 }
 0x492   : > { %v1481_v29 = vpop.eup %1480 }
 0x493   : > { %v1022_v32 = vmul.f32 %v1481_v29, %v789_v11 }
 0x4b1   : > { %v865_v17 = vpop.f32.mrf.mxu1 }
 0x4b2   : > { %v1024_v18 = vmul.f32 %v1475_v16, %v865_v17 }
 0x4b3   : > { %v1353_v19 = vpop.f32.mrf.mxu1 }
 0x4b4   : > { %1030 = vrot.lane.b32.xlu0 %v1024_v18, %s1679_s26 }
 0x4b5   : > { %v941_v21 = vpop.f32.mrf.mxu0 }
 0x4b6   : > { %v1026_v22 = vmul.f32 %v1477_v20, %v941_v21 }
 0x4b7   : > { %v1358_v23 = vpop.f32.mrf.mxu0 }
 0x4b8   : > { %1034 = vrot.lane.b32.xlu1 %v1026_v22, %s1680_s5 }
 0x4b9   : > { %v1017_v25 = vpop.f32.mrf.mxu1 }
 0x4ba   : > { %v1028_v26 = vmul.f32 %v1479_v24, %v1017_v25 }
 0x4bb   : > { %v1363_v27 = vpop.f32.mrf.mxu1 }
 0x4bc   : > { %1038 = vrot.lane.b32.xlu1 %v1028_v26, %s1681_s30 }
 0x526   : > { %v1031_v30 = vpop.permute.xlu0 %1030 }
 0x527   : > { %v1041_v33 = vsel %vm378_vm3, %v1022_v32, %v1031_v30 }
 0x52a   : > { %v1035_v31 = vpop.permute.xlu1 %1034 }
 0x52b   : > { %v1043_v34 = vsel %vm1042_vm4, %v1041_v33, %v1035_v31 }
 0x52e   : > { %v1039_v35 = vpop.permute.xlu1 %1038 }
 0x52f   : > { %v1045_v36 = vsel %vm1044_vm5, %v1043_v34, %v1039_v35 }
 0x530   : > { %v1046_v37 = vsel %vm270_vm1, %v1045_v36, 0.0 }
 0x531   : > { %1047 = vadd.xlane.f32.xlu0 %v1046_v37 }
 0x5ba   : > { %v1048_v38 = vpop.xlane.xlu0 %1047 }
 0x5bb   : > { %v1050_v39 = vmul.f32 0.03125, %v1048_v38 }
 0x5bd   : > { %v1051_v40 = vsub.f32 %v1045_v36, %v1050_v39 }
 0x5bf   : > { %v1052_v41 = vmul.f32 %v1051_v40, %v1051_v40 }
 0x5c1   : > { %v1053_v42 = vsel %vm270_vm1, %v1052_v41, 0.0 }
 0x5c2   : > { %1054 = vadd.xlane.f32.xlu1 %v1053_v42 }
 0x64b   : > { %v1055_v47 = vpop.xlane.xlu1 %1054 }
 0x64c   : > { %v1056_v48 = vmul.f32 0.03125, %v1055_v47 }
 0x64e   : > { %v1057_v49 = vadd.f32 1e-06, %v1056_v48 }
 0x650   : > { %1482 = vrsqrt.f32 %v1057_v49 }
 0x65d   : > { %v1483_v50 = vpop.eup %1482 }
 0x65e   : > { %v1059_v51 = vmul.f32 %v1483_v50, %v1051_v40 }
 0x660   : > { %1373 = vmatmul.mubr.msk.f32.vlgmr.msra.gmra.mxu0 %vm270_vm1, %v1059_v51 }
 0x720   : > { %v1137_v0 = vpop.f32.mrf.mxu0 }
 0x721   : > { %v1138_v54 = vadd.f32 %v1137_v0, %v1067_v53 }
 0x722   : > { %v1374_v55 = vpop.f32.mrf.mxu0 }
 0x723   : > { %1141 = vst [vmem:[%s256_s6] sm:$0xff] %v1138_v54 }
 0x724   : > { %1603 = shalt.err (!%p1600_p9)
}
 0x725   : > { %s1604_s11 = scalar_lea.hbm %s1931_s21, 128  ;;  %s1608_s25 = scalar_lea.hbm %s1972_s4, 256 }
 0x726   : > { %p1605_p13 = scmp.ne.s32.totalorder %s1931_s21, %s1604_s11  ;;  %p1609_p11 = scmp.lt.s32.totalorder %s1931_s21, %s1972_s4 }
 0x727   : > { %p1610_p1 = scmp.lt.s32.totalorder %s1608_s25, %s1604_s11 }
 0x728   : > { %p1606_p10 = pnand %p1605_p13, %p1990_p6 }
 0x729   : > { %p1611_p2 = por %p1610_p1, %p1609_p11 }
 0x72a   : > { %p1607_p8 = pneg %p1606_p10 }
 0x72c   : > { %p1612_p4 = pnand %p1611_p2, %p1607_p8 }
 0x72e   : > { %1615 = shalt.err (!%p1612_p4)
}
 0x72f   : > { %1389 = dma.vmem_to_hbm [thread:$0]  (%p1990_p6), %s1157_s7, 128, %s1931_s21, %s1143_s23  }
 0x730 PF: > { %s1168_s30 = sand.u32 1, %s1650_s15   ;;  %p1991_p12 = scmp.ne.s32.totalorder %s1978_s22, 0 }
 0x731   : > { %p1992_p0 = scmp.ge.s32.totalorder %s1662_s18, 2  ;;  %s1169_s29 = scalar_lea.sflag [#allocation4], %s1168_s30 }
 0x733   : > { %p1406_p5 = pnand %p1992_p0, %p1991_p12 }
 0x735   : > { %p1407_p3 = pneg %p1406_p5 }
 0x737   : > { %1645 = dma.done.wait (%p1407_p3), %s1169_s29, 128  }
 0x738   : > { %1647 = vsyncadd (%p1407_p3), %s1169_s29, 4294967168  ;;  %p19_p7 = scmp.ge.s32.totalorder %s1788_s24, 4   ;;  %s1993_s15 = smov %s1654_s16 }
 0x739   : > { %s1994_s16 = smov %s1658_s17  ;;  %s1995_s17 = smov %s1798_s27 }
 0x73a   : > { %s1996_s18 = smov %s1788_s24  ;;  %21 = sbr.rel (!%p19_p7) target bundleno = 7 (0x7), region = 93 }
 0x73f   :  { %1174 = vsyncpa [#allocation3], 1 }
 0x740   :  { %1176 = vsyncpa [#allocation3 + $0x1], 1 }
 0x741   :  { %1177 = vsyncpa [#allocation6], 1 }
 0x742   :  { %1178 = vsyncpa [#allocation9], 1 }
 0x743   :  { %1179 = vsyncpa [#allocation4], 1 }
 0x744   :  { %1181 = vsyncpa [#allocation4 + $0x1], 1 }

</bundles_post_ra>
